<compile_context>
chip_gen: v6e
topology: v6e:2x2x1
jax: 0.10.0
libtpu: 0.0.40
codegen_flags: <defaults>
</compile_context>

<pallas_src>
import jax
import jax.numpy as jnp
from jax.experimental import pallas as pl
from jax.experimental.pallas import tpu as pltpu


_WIN = 11
_SIGMA = 1.5
_C1 = 0.01 ** 2
_C2 = 0.03 ** 2
_BIN_EPS = 1e-5


# ----------------------------------------------------------------------------- constants
def _gauss_toeplitz(size, win=_WIN, sigma=_SIGMA):
    """(size, size) band matrix G with G[i, j] = g1d[j - i + win//2].

    Left-multiplying an image by G is exactly the zero-padded ('same') 1-D Gaussian
    convolution used by the standard pytorch_ssim window (G is symmetric).
    """
    half = win // 2
    xs = jnp.arange(win, dtype=jnp.float32) - float(half)
    g = jnp.exp(-(xs * xs) / (2.0 * sigma * sigma))
    g = g / jnp.sum(g)
    i = jnp.arange(size, dtype=jnp.int32)[:, None]
    j = jnp.arange(size, dtype=jnp.int32)[None, :]
    d = j - i + half
    valid = (d >= 0) & (d < win)
    return jnp.where(valid, g[jnp.clip(d, 0, win - 1)], 0.0).astype(jnp.float32)


def _gauss_kron_operator(h, w):
    """Fused separable 11x11 Gaussian blur ('same' padding) as one dense (H*W, H*W)
    operator acting on row-major flattened image ROW vectors: blur(x) = x_flat @ K."""
    return jnp.kron(_gauss_toeplitz(h), _gauss_toeplitz(w))


# ----------------------------------------------------------------------------- kernel
def _newton_recip(x):
    """EUP approximate reciprocal + one Newton-Raphson step -> full f32 accuracy."""
    r0 = pl.reciprocal(x, approx=True)
    return r0 * (2.0 - x * r0)


def _sum11(x):
    """(A, B) -> (1, 1) reduction (lane reduce then sublane reduce)."""
    return jnp.sum(jnp.sum(x, axis=1, keepdims=True), axis=0, keepdims=True)


def _tandem_ssim_kernel(fr_ref, fp_ref, ip_ref, ir_ref, k_ref, out_ref):
    step = pl.program_id(0)
    t = ip_ref.shape[0]                       # images in this step

    p = ip_ref[...].astype(jnp.float32)       # (T, HW), widened in-register (stream native dtype)
    r = ir_ref[...].astype(jnp.float32)

    # All five SSIM blur operands of all T images -> ONE MXU matmul against the resident
    # fused separable-Gaussian operator kron(gh, gw).
    stacked = jnp.concatenate([p, r, p * p, r * r, p * r], axis=0)          # (5T, HW)
    blurred = jnp.dot(stacked, k_ref[...], preferred_element_type=jnp.float32)

    mu1 = blurred[0 * t:1 * t]
    mu2 = blurred[1 * t:2 * t]
    e11 = blurred[2 * t:3 * t]
    e22 = blurred[3 * t:4 * t]
    e12 = blurred[4 * t:5 * t]

    mu1mu2 = mu1 * mu2
    mu1sq = mu1 * mu1
    mu2sq = mu2 * mu2
    s12 = e12 - mu1mu2

    num = (2.0 * mu1mu2 + _C1) * (2.0 * s12 + _C2)
    den = (mu1sq + mu2sq + _C1) * ((e11 - mu1sq) + (e22 - mu2sq) + _C2)
    ssim_map = num * _newton_recip(den)                     # divide kept off the VALU

    bin_map = _newton_recip((p - 0.5) ** 2 + _BIN_EPS)      # BinaryGood map (prediction only)

    ssim_sum = _sum11(ssim_map)                             # (1, 1) per-step partials
    bin_sum = _sum11(bin_map)

    # Tiny Feat MSE numerator: resident blocks; counted once (step 0) so the wrapper-side
    # sum over per-step partials recovers the exact sum of squared errors.
    d = fp_ref[...].astype(jnp.float32) - fr_ref[...].astype(jnp.float32)
    curve_sse = jnp.where(step == 0, _sum11(d * d), jnp.zeros((1, 1), jnp.float32))

    # Lane-dense, (8,128)-aligned partial write: lane 0 = ssim sum, 1 = binary sum,
    # 2 = feat SSE (step 0 only), rest zero.  (Same value replicated over the 8 sublanes;
    # the wrapper reads row 0.)
    lane = jax.lax.broadcasted_iota(jnp.int32, (8, 128), 1)
    out_ref[...] = jnp.where(lane == 0, ssim_sum,
                   jnp.where(lane == 1, bin_sum,
                   jnp.where(lane == 2, curve_sse, 0.0)))


# ----------------------------------------------------------------------------- sizing helpers
def _round_up(x, m):
    return -(-x // m) * m


def _padded_bytes(rows, cols, itemsize):
    """Real VMEM footprint of a (rows, cols) array: sublane-pack + 128-lane padding."""
    pack = max(1, 32 // itemsize)             # 8 for f32, 16 for bf16, 32 for int8
    return _round_up(max(rows, 1), pack) * _round_up(max(cols, 1), 128) * itemsize


def _vmem_capacity_bytes():
    try:
        info = pltpu.get_tpu_info()
        cap = getattr(info, "vmem_capacity_bytes", None)
        if cap:
            return int(cap)
    except Exception:
        pass
    return 64 << 20                           # conservative: v7x per-TensorCore VMEM


# ----------------------------------------------------------------------------- wrapper
def tandem_loss_ssim(feat_real, feat_pred, imag_real, imag_pred, gamma=0.0,
                     images_per_step=None):
    """Returns (loss, accu) float32 scalars, matching TandemLossSSIM.forward."""
    B, C, H, W = imag_pred.shape
    N, HW = B * C, H * W

    if HW > 2048:
        # TODO(synk): for larger images switch the blur to a separable banded-Toeplitz /
        # pltpu.roll 11-tap path; the dense kron operator grows as (H*W)^2.
        raise NotImplementedError("tandem_loss_ssim: H*W > 2048 needs the separable blur path")

    # Lane-dense flattened-image rows; native dtype (the kernel widens in-register).
    ip = imag_pred.reshape(N, HW)
    ir = imag_real.reshape(N, HW)
    fr = feat_real.reshape(feat_real.shape[0], -1)
    fp = feat_pred.reshape(feat_pred.shape[0], -1)
    feat_n = fr.shape[0] * fr.shape[1]

    itemsize = imag_pred.dtype.itemsize
    hw_pad = _round_up(HW, 128)

    # --- tile sizing from *padded* bytes, including the in-kernel f32 working set ---
    # ~18 live (T, HW) f32 arrays (widened inputs, 5 stacked + 5 blurred operands, SSIM
    # temps) + 2 inputs x 2 pipeline buffers of the streamed native-dtype tile.
    big_vmem = _vmem_capacity_bytes() >= (96 << 20)          # v5e/v6e have 128 MiB
    work_budget = (40 << 20) if big_vmem else (20 << 20)
    per_image_bytes = 18 * 4 * hw_pad + 2 * 2 * itemsize * hw_pad
    t_cap = max(1, work_budget // per_image_bytes)

    if images_per_step is None:
        aligned = [d for d in range(1, N + 1) if N % d == 0 and (d % 8 == 0 or d == N)]
        fitting = [d for d in aligned if d <= t_cap]
        T = max(fitting) if fitting else min(aligned)
    else:
        T = int(images_per_step)
        assert N % T == 0, "images_per_step must divide B*C"
        assert T % 8 == 0 or T == N, "images_per_step should be a multiple of 8 (or B*C)"
    n_steps = N // T

    # --- vmem limit from the real padded totals ---
    k_bytes = _padded_bytes(HW, HW, 4)
    feat_bytes = (_padded_bytes(fr.shape[0], fr.shape[1], fr.dtype.itemsize)
                  + _padded_bytes(fp.shape[0], fp.shape[1], fp.dtype.itemsize))
    stream_bytes = 2 * 2 * _padded_bytes(T, HW, itemsize)
    work_bytes = 18 * _padded_bytes(T, HW, 4) + 2 * _padded_bytes(5 * T, HW, 4)
    out_bytes = 2 * _padded_bytes(8, 128, 4)
    total = k_bytes + feat_bytes + stream_bytes + work_bytes + out_bytes
    vmem_limit = int(min(max(total * 3 // 2 + (2 << 20), 16 << 20), 56 << 20))

    kblur = _gauss_kron_operator(H, W)                       # (HW, HW) f32, resident

    partials = pl.pallas_call(
        _tandem_ssim_kernel,
        out_shape=jax.ShapeDtypeStruct((8, n_steps * 128), jnp.float32),
        grid=(n_steps,),
        in_specs=[
            pl.BlockSpec(fr.shape, lambda i: (0, 0)),         # Feat_Real (resident)
            pl.BlockSpec(fp.shape, lambda i: (0, 0)),         # Feat_Pred (resident)
            pl.BlockSpec((T, HW), lambda i: (i, 0)),          # Imag_Pred rows (streamed)
            pl.BlockSpec((T, HW), lambda i: (i, 0)),          # Imag_Real rows (streamed)
            pl.BlockSpec((HW, HW), lambda i: (0, 0)),         # fused Gaussian operator
        ],
        out_specs=pl.BlockSpec((8, 128), lambda i: (0, i)),   # lane-dense per-step partials
        compiler_params=pltpu.CompilerParams(
            dimension_semantics=("parallel",),                # independent steps -> both TCs on v7x
            vmem_limit_bytes=vmem_limit),
    )(fr, fp, ip, ir, kblur)

    # Tiny scalar epilogue (exactly the PyTorch combination); partial sums -> means -> mix.
    sums = jnp.sum(partials[0].reshape(n_steps, 128), axis=0)
    n_pix = float(N * H * W)
    ssim_mean = sums[0] / n_pix
    bin_mean = sums[1] / n_pix
    curve = sums[2] / float(feat_n)
    gamma = float(gamma)
    loss = (1.0 - gamma) * curve + gamma * (1.0 - ssim_mean) + 0.1 * bin_mean
    return loss, bin_mean


# ----------------------------------------------------------------------------- reference
def _reference(feat_real, feat_pred, imag_real, imag_pred, gamma):
    """Pure-JAX reference with identical semantics, for sanity checking."""
    curve = jnp.mean((feat_pred.astype(jnp.float32) - feat_real.astype(jnp.float32)) ** 2)
    B, C, H, W = imag_pred.shape
    gh = _gauss_toeplitz(H)
    gw = _gauss_toeplitz(W)
    p = imag_pred.astype(jnp.float32)
    r = imag_real.astype(jnp.float32)

    def blur(x):
        return jnp.einsum('uh,bchw,wv->bcuv', gh, x, gw)

    mu1, mu2 = blur(p), blur(r)
    s11 = blur(p * p) - mu1 * mu1
    s22 = blur(r * r) - mu2 * mu2
    s12 = blur(p * r) - mu1 * mu2
    ssim_map = ((2 * mu1 * mu2 + _C1) * (2 * s12 + _C2)) / \
               ((mu1 * mu1 + mu2 * mu2 + _C1) * (s11 + s22 + _C2))
    ssim_val = jnp.mean(ssim_map)
    binary = jnp.mean(1.0 / ((p - 0.5) ** 2 + _BIN_EPS))
    loss = (1.0 - gamma) * curve + gamma * (1.0 - ssim_val) + 0.1 * binary
    return loss, binary


if __name__ == "__main__":
    key = jax.random.PRNGKey(0)
    k1, k2, k3, k4 = jax.random.split(key, 4)

    B, F = 2, 32            # Feat: (batch, feature)
    C, H, W = 8, 16, 16     # Imag: NCHW -> N = B*C = 16 images

    feat_real = jax.random.normal(k1, (B, F), dtype=jnp.float32)
    feat_pred = jax.random.normal(k2, (B, F), dtype=jnp.float32)
    imag_real = jax.random.uniform(k3, (B, C, H, W), dtype=jnp.float32)
    imag_pred = jax.random.uniform(k4, (B, C, H, W), dtype=jnp.float32)

    gamma = 0.3  # exercise every term of the combination (module default is 0)

    # 8 images/step -> sublane-aligned tiles and a 2-step ("parallel") grid, exercising the
    # per-step partial-output path.
    loss, accu = tandem_loss_ssim(feat_real, feat_pred, imag_real, imag_pred,
                                  gamma=gamma, images_per_step=8)
    loss = jax.block_until_ready(loss)
    accu = jax.block_until_ready(accu)

    ref_loss, ref_accu = _reference(feat_real, feat_pred, imag_real, imag_pred, gamma)
    # BinaryGood now uses a Newton-refined reciprocal (full f32); remaining slack only
    # covers MXU f32-matmul precision and summation-order differences.
    assert jnp.allclose(loss, ref_loss, rtol=1e-2, atol=1e-2), (loss, ref_loss)
    assert jnp.allclose(accu, ref_accu, rtol=5e-3, atol=1e-2), (accu, ref_accu)

    print("KERNEL_OK")
</pallas_src>

<mosaic_0001>
module attributes {stable_mosaic.version = 11 : i64} {
  func.func @_tandem_ssim_kernel(%arg0: i32, %arg1: memref<2x32xf32, #tpu.memory_space<vmem>>, %arg2: memref<2x32xf32, #tpu.memory_space<vmem>>, %arg3: memref<8x256xf32, #tpu.memory_space<vmem>>, %arg4: memref<8x256xf32, #tpu.memory_space<vmem>>, %arg5: memref<256x256xf32, #tpu.memory_space<vmem>>, %arg6: memref<8x128xf32, #tpu.memory_space<vmem>>) attributes {dimension_semantics = [#tpu.dimension_semantics<parallel>], iteration_bounds = array<i64: 2>, scalar_prefetch = 0 : i64, scratch_operands = 0 : i64, tpu.core_type = #tpu.core_type<tc>, window_params = [{pipeline_mode = #tpu.pipeline_mode<synchronous>, transform_indices = @transform_0, window_bounds = array<i64: 2, 32>}, {pipeline_mode = #tpu.pipeline_mode<synchronous>, transform_indices = @transform_1, window_bounds = array<i64: 2, 32>}, {transform_indices = @transform_2, window_bounds = array<i64: 8, 256>}, {transform_indices = @transform_3, window_bounds = array<i64: 8, 256>}, {pipeline_mode = #tpu.pipeline_mode<synchronous>, transform_indices = @transform_4, window_bounds = array<i64: 256, 256>}, {transform_indices = @transform_5, window_bounds = array<i64: 8, 128>}]} {
    %c0 = arith.constant 0 : index
    %c0_0 = arith.constant 0 : index
    %0 = vector.load %arg3[%c0, %c0_0] : memref<8x256xf32, #tpu.memory_space<vmem>>, vector<8x256xf32>
    %c0_1 = arith.constant 0 : index
    %c0_2 = arith.constant 0 : index
    %1 = vector.load %arg4[%c0_1, %c0_2] : memref<8x256xf32, #tpu.memory_space<vmem>>, vector<8x256xf32>
    %2 = arith.mulf %0, %0 : vector<8x256xf32>
    %3 = arith.mulf %1, %1 : vector<8x256xf32>
    %4 = arith.mulf %0, %1 : vector<8x256xf32>
    %5 = tpu.concatenate %0, %1, %2, %3, %4 in 0 : vector<8x256xf32>, vector<8x256xf32>, vector<8x256xf32>, vector<8x256xf32>, vector<8x256xf32> -> vector<40x256xf32>
    %c0_3 = arith.constant 0 : index
    %c0_4 = arith.constant 0 : index
    %6 = vector.load %arg5[%c0_3, %c0_4] : memref<256x256xf32, #tpu.memory_space<vmem>>, vector<256x256xf32>
    %cst = arith.constant dense<0.000000e+00> : vector<40x256xf32>
    %7 = tpu.matmul %5, %6, %cst {dimension_numbers = #tpu.dot_dimension_numbers<[1], [0], [0], [1], [0, 0, 1, 1], [], []>} : vector<40x256xf32>, vector<256x256xf32>, vector<40x256xf32> -> vector<40x256xf32>
    %8 = vector.extract_strided_slice %7 {offsets = [0, 0], sizes = [8, 256], strides = [1, 1]} : vector<40x256xf32> to vector<8x256xf32>
    %9 = vector.extract_strided_slice %7 {offsets = [8, 0], sizes = [8, 256], strides = [1, 1]} : vector<40x256xf32> to vector<8x256xf32>
    %10 = vector.extract_strided_slice %7 {offsets = [16, 0], sizes = [8, 256], strides = [1, 1]} : vector<40x256xf32> to vector<8x256xf32>
    %11 = vector.extract_strided_slice %7 {offsets = [24, 0], sizes = [8, 256], strides = [1, 1]} : vector<40x256xf32> to vector<8x256xf32>
    %12 = vector.extract_strided_slice %7 {offsets = [32, 0], sizes = [8, 256], strides = [1, 1]} : vector<40x256xf32> to vector<8x256xf32>
    %13 = arith.mulf %8, %9 : vector<8x256xf32>
    %14 = arith.mulf %8, %8 : vector<8x256xf32>
    %15 = arith.mulf %9, %9 : vector<8x256xf32>
    %16 = arith.subf %12, %13 : vector<8x256xf32>
    %cst_5 = arith.constant 2.000000e+00 : f32
    %17 = vector.broadcast %cst_5 : f32 to vector<8x256xf32>
    %18 = arith.mulf %17, %13 : vector<8x256xf32>
    %cst_6 = arith.constant 9.99999974E-5 : f32
    %19 = vector.broadcast %cst_6 : f32 to vector<8x256xf32>
    %20 = arith.addf %18, %19 : vector<8x256xf32>
    %cst_7 = arith.constant 2.000000e+00 : f32
    %21 = vector.broadcast %cst_7 : f32 to vector<8x256xf32>
    %22 = arith.mulf %21, %16 : vector<8x256xf32>
    %cst_8 = arith.constant 8.99999984E-4 : f32
    %23 = vector.broadcast %cst_8 : f32 to vector<8x256xf32>
    %24 = arith.addf %22, %23 : vector<8x256xf32>
    %25 = arith.mulf %20, %24 : vector<8x256xf32>
    %26 = arith.addf %14, %15 : vector<8x256xf32>
    %cst_9 = arith.constant 9.99999974E-5 : f32
    %27 = vector.broadcast %cst_9 : f32 to vector<8x256xf32>
    %28 = arith.addf %26, %27 : vector<8x256xf32>
    %29 = arith.subf %10, %14 : vector<8x256xf32>
    %30 = arith.subf %11, %15 : vector<8x256xf32>
    %31 = arith.addf %29, %30 : vector<8x256xf32>
    %cst_10 = arith.constant 8.99999984E-4 : f32
    %32 = vector.broadcast %cst_10 : f32 to vector<8x256xf32>
    %33 = arith.addf %31, %32 : vector<8x256xf32>
    %34 = arith.mulf %28, %33 : vector<8x256xf32>
    %35 = tpu.reciprocal %34 {approx = true} : vector<8x256xf32> -> vector<8x256xf32>
    %36 = arith.mulf %34, %35 : vector<8x256xf32>
    %cst_11 = arith.constant 2.000000e+00 : f32
    %37 = vector.broadcast %cst_11 : f32 to vector<8x256xf32>
    %38 = arith.subf %37, %36 : vector<8x256xf32>
    %39 = arith.mulf %35, %38 : vector<8x256xf32>
    %40 = arith.mulf %25, %39 : vector<8x256xf32>
    %cst_12 = arith.constant 5.000000e-01 : f32
    %41 = vector.broadcast %cst_12 : f32 to vector<8x256xf32>
    %42 = arith.subf %0, %41 : vector<8x256xf32>
    %43 = arith.mulf %42, %42 : vector<8x256xf32>
    %cst_13 = arith.constant 9.99999974E-6 : f32
    %44 = vector.broadcast %cst_13 : f32 to vector<8x256xf32>
    %45 = arith.addf %43, %44 : vector<8x256xf32>
    %46 = tpu.reciprocal %45 {approx = true} : vector<8x256xf32> -> vector<8x256xf32>
    %47 = arith.mulf %45, %46 : vector<8x256xf32>
    %cst_14 = arith.constant 2.000000e+00 : f32
    %48 = vector.broadcast %cst_14 : f32 to vector<8x256xf32>
    %49 = arith.subf %48, %47 : vector<8x256xf32>
    %50 = arith.mulf %46, %49 : vector<8x256xf32>
    %cst_15 = arith.constant dense<0.000000e+00> : vector<8xf32>
    %51 = vector.multi_reduction <add>, %40, %cst_15 [1] : vector<8x256xf32> to vector<8xf32>
    %52 = vector.shape_cast %51 : vector<8xf32> to vector<8x1xf32>
    %cst_16 = arith.constant dense<0.000000e+00> : vector<1xf32>
    %53 = vector.multi_reduction <add>, %52, %cst_16 [0] : vector<8x1xf32> to vector<1xf32>
    %54 = vector.shape_cast %53 : vector<1xf32> to vector<1x1xf32>
    %cst_17 = arith.constant dense<0.000000e+00> : vector<8xf32>
    %55 = vector.multi_reduction <add>, %50, %cst_17 [1] : vector<8x256xf32> to vector<8xf32>
    %56 = vector.shape_cast %55 : vector<8xf32> to vector<8x1xf32>
    %cst_18 = arith.constant dense<0.000000e+00> : vector<1xf32>
    %57 = vector.multi_reduction <add>, %56, %cst_18 [0] : vector<8x1xf32> to vector<1xf32>
    %58 = vector.shape_cast %57 : vector<1xf32> to vector<1x1xf32>
    %c0_19 = arith.constant 0 : index
    %c0_20 = arith.constant 0 : index
    %59 = vector.load %arg2[%c0_19, %c0_20] : memref<2x32xf32, #tpu.memory_space<vmem>>, vector<2x32xf32>
    %c0_21 = arith.constant 0 : index
    %c0_22 = arith.constant 0 : index
    %60 = vector.load %arg1[%c0_21, %c0_22] : memref<2x32xf32, #tpu.memory_space<vmem>>, vector<2x32xf32>
    %61 = arith.subf %59, %60 : vector<2x32xf32>
    %c0_i32 = arith.constant 0 : i32
    %62 = arith.cmpi eq, %arg0, %c0_i32 : i32
    %63 = arith.mulf %61, %61 : vector<2x32xf32>
    %cst_23 = arith.constant dense<0.000000e+00> : vector<2xf32>
    %64 = vector.multi_reduction <add>, %63, %cst_23 [1] : vector<2x32xf32> to vector<2xf32>
    %65 = vector.shape_cast %64 : vector<2xf32> to vector<2x1xf32>
    %cst_24 = arith.constant dense<0.000000e+00> : vector<1xf32>
    %66 = vector.multi_reduction <add>, %65, %cst_24 [0] : vector<2x1xf32> to vector<1xf32>
    %67 = vector.shape_cast %66 : vector<1xf32> to vector<1x1xf32>
    %cst_25 = arith.constant 0.000000e+00 : f32
    %68 = vector.broadcast %cst_25 : f32 to vector<1x1xf32>
    %69 = arith.select %62, %67, %68 : vector<1x1xf32>
    %70 = tpu.iota {dimensions = array<i32: 1>} : vector<8x128xi32>
    %c0_i32_26 = arith.constant 0 : i32
    %71 = vector.broadcast %c0_i32_26 : i32 to vector<8x128xi32>
    %72 = arith.cmpi eq, %70, %71 : vector<8x128xi32>
    %c1_i32 = arith.constant 1 : i32
    %73 = vector.broadcast %c1_i32 : i32 to vector<8x128xi32>
    %74 = arith.cmpi eq, %70, %73 : vector<8x128xi32>
    %c2_i32 = arith.constant 2 : i32
    %75 = vector.broadcast %c2_i32 : i32 to vector<8x128xi32>
    %76 = arith.cmpi eq, %70, %75 : vector<8x128xi32>
    %cst_27 = arith.constant 0.000000e+00 : f32
    %77 = vector.shape_cast %69 : vector<1x1xf32> to vector<1x1xf32>
    %78 = vector.broadcast %77 : vector<1x1xf32> to vector<8x128xf32>
    %79 = vector.broadcast %cst_27 : f32 to vector<8x128xf32>
    %80 = arith.select %76, %78, %79 : vector<8x128xi1>, vector<8x128xf32>
    %81 = vector.shape_cast %58 : vector<1x1xf32> to vector<1x1xf32>
    %82 = vector.broadcast %81 : vector<1x1xf32> to vector<8x128xf32>
    %83 = arith.select %74, %82, %80 : vector<8x128xi1>, vector<8x128xf32>
    %84 = vector.shape_cast %54 : vector<1x1xf32> to vector<1x1xf32>
    %85 = vector.broadcast %84 : vector<1x1xf32> to vector<8x128xf32>
    %86 = arith.select %72, %85, %83 : vector<8x128xi1>, vector<8x128xf32>
    %c0_28 = arith.constant 0 : index
    %c0_29 = arith.constant 0 : index
    %87 = vector.load %arg6[%c0_28, %c0_29] : memref<8x128xf32, #tpu.memory_space<vmem>>, vector<8x128xf32>
    tpu.vector_store %arg6[%c0_28, %c0_29], %86 {strides = array<i32>} : memref<8x128xf32, #tpu.memory_space<vmem>>, vector<8x128xf32>,
    return
  }
  func.func @transform_0(%arg0: i32) -> (i32, i32) {
    %c0_i32 = arith.constant 0 : i32
    %c0_i32_0 = arith.constant 0 : i32
    %c0_i32_1 = arith.constant 0 : i32
    return %c0_i32, %c0_i32_0 : i32, i32
  }
  func.func @transform_1(%arg0: i32) -> (i32, i32) {
    %c0_i32 = arith.constant 0 : i32
    %c0_i32_0 = arith.constant 0 : i32
    %c0_i32_1 = arith.constant 0 : i32
    return %c0_i32, %c0_i32_0 : i32, i32
  }
  func.func @transform_2(%arg0: i32) -> (i32, i32) {
    %c0_i32 = arith.constant 0 : i32
    %c0_i32_0 = arith.constant 0 : i32
    return %arg0, %c0_i32 : i32, i32
  }
  func.func @transform_3(%arg0: i32) -> (i32, i32) {
    %c0_i32 = arith.constant 0 : i32
    %c0_i32_0 = arith.constant 0 : i32
    return %arg0, %c0_i32 : i32, i32
  }
  func.func @transform_4(%arg0: i32) -> (i32, i32) {
    %c0_i32 = arith.constant 0 : i32
    %c0_i32_0 = arith.constant 0 : i32
    %c0_i32_1 = arith.constant 0 : i32
    return %c0_i32, %c0_i32_0 : i32, i32
  }
  func.func @transform_5(%arg0: i32) -> (i32, i32) {
    %c0_i32 = arith.constant 0 : i32
    %c0_i32_0 = arith.constant 0 : i32
    return %c0_i32, %arg0 : i32, i32
  }
}

</mosaic_0001>

<bundles_post_ra>
// kernel: tpu_custom_call.1
= control target key start
LH: loop header
LB: loop body
LE: loop exit
PB: predicated region body
PF: predicated region fallthrough
CT: control target
= control target key end

     0   :  { %s1391_s0 = inlined_call_operand.hbm [shape: f32[2,32], index: 0, kind: input, shape index: {}]   ;;  %s1392_s1 = inlined_call_operand.hbm [shape: f32[2,32], index: 1, kind: input, shape index: {}]   ;;  %s1393_s2 = inlined_call_operand.hbm [shape: f32[16,256], index: 2, kind: input, shape index: {}]   ;;  %s1394_s3 = inlined_call_operand.hbm [shape: f32[16,256], index: 3, kind: input, shape index: {}]   ;;  %s1395_s4 = inlined_call_operand.hbm [shape: f32[256,256], index: 4, kind: input, shape index: {}]   ;;  %s1396_s5 = inlined_call_operand.hbm [shape: f32[8,256], index: 5, kind: output, shape index: {}]  }
   0x1   :  { %1404 = sst [smem:[#allocation17_spill]] %s1391_s0 }
   0x2   :  { %1405 = sst [smem:[#allocation18_spill]] %s1392_s1 }
   0x3   :  { %1406 = sst [smem:[#allocation19_spill]] %s1393_s2 }
   0x4   :  { %10 = vsyncpa [#allocation3], 0 }
   0x5   :  { %11 = vsyncpa [#allocation6], 0 }
   0x6   :  { %12 = vsyncpa [#allocation4], 0 }
   0x7   :  { %14 = vsyncpa [#allocation4 + $0x1], 0  ;;  %s1151_s18 = smov 0   ;;  %s1153_s19 = smov 0  }
   0x8   :  { %s1155_s20 = smov 0   ;;  %s1157_s21 = smov 0  }
   0x9 LB: > { %s1172_s22 = sadd.s32 4294967295, %s1111_s21   ;;  %s718_s23 = sadd.s32 4294967294, %s1111_s21   ;;  %s1111_s21 = sphi %s1157_s21, %s1438_s21   ;;  %s1107_s20 = sphi %s1155_s20, %s1437_s20   ;;  %s1103_s19 = sphi %s1153_s19, %s1436_s19   ;;  %s1099_s18 = sphi %s1151_s18, %s1435_s18  }
   0xa   : > { %p82_p0 = scmp.ne.s32.totalorder %s1103_s19, %s1099_s18  ;;  %p1397_p1 = scmp.eq.s32.totalorder %s1172_s22, 0 }
   0xb   : > { %p159_p3 = scmp.eq.s32.totalorder %s718_s23, 1  ;;  %p719_p5 = scmp.ge.s32.totalorder %s1111_s21, 1 }
   0xc   : > { %p1181_p4 = por %p1397_p1, %p82_p0  ;;  %p166_p7 = scmp.lt.s32.totalorder %s1111_s21, 3 }
   0xd   : > { %p1186_p6 = por %p159_p3, %p82_p0  ;;  %s1113_s27 = smov [#allocation2]  }
   0xe   : > { %s1407_s24 = scalar_select %p1181_p4, 1, 0 }
   0xf   : > { %s1408_s25 = scalar_select %p1186_p6, 1, 0 }
  0x10   : > { %p1191_p8 = pnand %p719_p5, %p166_p7  ;;  %s179_s28 = sshll.u32 %s1113_s27, 4  ;;  %s180_s28 = int_to_ptr.vmem [resolvable:$true] %s179_s28 }
  0x11   : > { %s1114_s29 = smov [#allocation5]   ;;  %s1205_s7 = sadd.s32 1, %s1111_s21  }
  0x12   : > { %s1409_s26 = scalar_select %p1191_p8, 1, 0 }
  0x13   : > { %p827_p10 = pneg %p1191_p8  ;;  %s190_s30 = sshll.u32 %s1114_s29, 4  ;;  %s191_s30 = int_to_ptr.vmem [resolvable:$true] %s190_s30 }
  0x14   : > { %s66_s8 = ssub.s32 %s1111_s21, %s1205_s7  ;;  %s912_s9 = scalar_lea.vmem %s180_s28, 32 }
  0x15   : > { %p1200_p11 = pnand %p827_p10, %p1397_p1  ;;  %p913_p13 = scmp.ne.s32.totalorder %s180_s28, %s912_s9 }
  0x16   : > { %p920_p5 = scmp.lt.s32.totalorder %s180_s28, %s180_s28  ;;  %p921_p7 = scmp.lt.s32.totalorder %s912_s9, %s912_s9 }
  0x17   : > { %p1401_p12 = pneg %p1200_p11 }
  0x18   : > { %p922_p10 = por %p921_p7, %p920_p5 }
  0x19   : > { %p915_p0 = pnand %p913_p13, %p1401_p12 }
  0x1b   : > { %p916_p3 = pneg %p915_p0 }
  0x1d   : > { %p923_p9 = pnand %p922_p10, %p916_p3 }
  0x1f   : > { %926 = shalt.err (!%p923_p9)
}
  0x20   : > { %s1411_s0 = sld [smem:[#allocation17_spill]]  ;;  %s938_s12 = scalar_lea.vmem %s191_s30, 32 }
  0x21   : > { %p939_p1 = scmp.ne.s32.totalorder %s191_s30, %s938_s12  ;;  %p946_p13 = scmp.lt.s32.totalorder %s191_s30, %s191_s30 }
  0x22   : > { %p947_p0 = scmp.lt.s32.totalorder %s938_s12, %s938_s12 }
  0x23   : > { %p941_p2 = pnand %p939_p1, %p1401_p12 }
  0x24   : > { %p948_p4 = por %p947_p0, %p946_p13 }
  0x25   : > { %p942_p6 = pneg %p941_p2 }
  0x26   : > { %830 = dma.hbm_to_vmem [thread:$0]  (!%p1200_p11), %s1411_s0, 32, %s180_s28, [#allocation3]  }
  0x27   : > { %p949_p8 = pnand %p948_p4, %p942_p6 }
  0x29   : > { %952 = shalt.err (!%p949_p8)
}
  0x2a   : > { %s1412_s1 = sld [smem:[#allocation18_spill]]  ;;  %p67_p1 = scmp.eq.s32.totalorder %s66_s8, 0 }
  0x2b   : > { %s69_s15 = sadd.s32 1, %s1107_s20  ;;  %p76_p2 = scmp.ne.s32.totalorder %s1107_s20, %s1103_s19 }
  0x2c   : > { %p77_p4 = scmp.eq.s32.totalorder %s1111_s21, 0  ;;  %p1414_p8 = scmp.eq.s32.totalorder %s1172_s22, 1 }
  0x2d   : > { %s1232_s16 = scalar_select %p67_p1, %s1107_s20, %s69_s15  }
  0x2e   : > { %p78_p6 = por %p77_p4, %p76_p2  ;;  %p1236_p9 = por %p1414_p8, %p76_p2 }
  0x2f   : > { %1413 = sst [smem:[#allocation16_spill]] %s1232_s16  ;;  %p851_p3 = scmp.lt.s32.totalorder %s1111_s21, 2 }
  0x30   : > { %833 = dma.hbm_to_vmem [thread:$0]  (!%p1200_p11), %s1412_s1, 32, %s191_s30, [#allocation6]  }
  0x31   : > { %s1415_s17 = scalar_select %p1236_p9, 1, 0 }
  0x32   : > { %s214_s23 = sand.u32 1, %s1111_s21   ;;  %s216_s27 = sand.u32 1, %s1107_s20  }
  0x33   : > { %s1243_s28 = sshll.u32 %s216_s27, 4  ;;  %s1400_s29 = sshll.u32 %s1111_s21, 8 }
  0x34   : > { %s1416_s2 = sld [smem:[#allocation19_spill]]  ;;  %s218_s10 = scalar_lea.vmem [#allocation7], %s1243_s28 }
  0x35   : > { %s226_s11 = sshll.u32 %s218_s10, 4  ;;  %p1254_p5 = pnand %p851_p3, %p78_p6  ;;  %s1258_s11 = int_to_ptr.vmem [resolvable:$true] %s226_s11 }
  0x36   : > { %s1115_s13 = smov [#allocation9]   ;;  %s1260_s15 = scalar_lea.sflag [#allocation3], %s214_s23 }
  0x37   : > { %s200_s14 = sshll.u32 %s1115_s13, 4  ;;  %p1403_p10 = pneg %p1254_p5  ;;  %s201_s14 = int_to_ptr.vmem [resolvable:$true] %s200_s14 }
  0x3a   : > { %s1251_s9 = scalar_lea.hbm %s1416_s2, %s1400_s29  ;;  %s958_s10 = scalar_lea.hbm %s1416_s2, 512 }
  0x3b   : > { %s953_s27 = scalar_lea.hbm %s1251_s9, 256  ;;  %p959_p1 = scmp.lt.s32.totalorder %s1251_s9, %s1416_s2 }
  0x3c   : > { %p954_p7 = scmp.ne.s32.totalorder %s1251_s9, %s953_s27  ;;  %p960_p2 = scmp.lt.s32.totalorder %s958_s10, %s953_s27 }
  0x3e   : > { %p956_p13 = pnand %p1403_p10, %p954_p7  ;;  %p961_p4 = por %p960_p2, %p959_p1 }
  0x40   : > { %p957_p0 = pneg %p956_p13 }
  0x42   : > { %p962_p6 = pnand %p961_p4, %p957_p0 }
  0x44   : > { %965 = shalt.err (!%p962_p6)
}
  0x45   : > { %s966_s23 = scalar_lea.vmem %s1258_s11, 256  ;;  %s1116_s13 = smov [#allocation7]  }
  0x46   : > { %p967_p8 = scmp.ne.s32.totalorder %s1258_s11, %s966_s23  ;;  %s971_s30 = sshll.u32 %s1116_s13, 4  ;;  %s972_s30 = int_to_ptr.vmem [resolvable:$false] %s971_s30 }
  0x47   : > { %s973_s8 = scalar_lea.vmem %s972_s30, 512  ;;  %p974_p13 = scmp.lt.s32.totalorder %s1258_s11, %s972_s30 }
  0x48   : > { %p969_p3 = pnand %p967_p8, %p1403_p10  ;;  %p975_p12 = scmp.lt.s32.totalorder %s973_s8, %s966_s23 }
  0x4a   : > { %p970_p7 = pneg %p969_p3  ;;  %p976_p9 = por %p975_p12, %p974_p13 }
  0x4c   : > { %p977_p1 = pnand %p976_p9, %p970_p7 }
  0x4e   : > { %980 = shalt.err (!%p977_p1)
}
  0x4f   : > { %840 = dma.hbm_to_vmem [thread:$0]  (!%p1254_p5), %s1251_s9, 256, %s1258_s11, %s1260_s15  }
  0x50   : > { %s992_s0 = scalar_lea.vmem %s201_s14, 8192  ;;  %p1418_p2 = pneg %p1200_p11 }
  0x51   : > { %p993_p0 = scmp.ne.s32.totalorder %s201_s14, %s992_s0  ;;  %p1000_p8 = scmp.lt.s32.totalorder %s201_s14, %s201_s14 }
  0x52   : > { %p1001_p3 = scmp.lt.s32.totalorder %s992_s0, %s992_s0 }
  0x53   : > { %p995_p4 = pnand %p993_p0, %p1418_p2 }
  0x54   : > { %p1002_p10 = por %p1001_p3, %p1000_p8 }
  0x55   : > { %p996_p6 = pneg %p995_p4 }
  0x57   : > { %p1003_p12 = pnand %p1002_p10, %p996_p6 }
  0x59   : > { %1006 = shalt.err (!%p1003_p12)
}
  0x5a   : > { %s1117_s29 = smov 256   ;;  %s1118_s27 = smov 16  }
  0x5b   : > { %836 = dma.hbm_to_vmem [thread:$0]  (!%p1200_p11), %s1395_s4, 8192, %s201_s14, [#allocation6], %s1117_s29, %s1117_s29, %s1118_s27  }
  0x5c   : > { %s1419_s10 = sshll.u32 %s1111_s21, 8  ;;  %s237_s8 = scalar_lea.vmem [#allocation8], %s1243_s28 }
  0x5d   : > { %s243_s30 = scalar_lea.hbm %s1394_s3, %s1419_s10  ;;  %s245_s0 = sshll.u32 %s237_s8, 4  ;;  %s246_s0 = int_to_ptr.vmem [resolvable:$true] %s245_s0 }
  0x5e   : > { %s1007_s1 = scalar_lea.hbm %s243_s30, 256  ;;  %p1420_p10 = pneg %p1254_p5 }
  0x5f   : > { %p1008_p9 = scmp.ne.s32.totalorder %s243_s30, %s1007_s1  ;;  %s1012_s16 = scalar_lea.hbm %s1394_s3, 512 }
  0x60   : > { %p1013_p11 = scmp.lt.s32.totalorder %s243_s30, %s1394_s3  ;;  %p1014_p1 = scmp.lt.s32.totalorder %s1012_s16, %s1007_s1 }
  0x61   : > { %p1010_p7 = pnand %p1008_p9, %p1420_p10 }
  0x62   : > { %p1015_p0 = por %p1014_p1, %p1013_p11 }
  0x63   : > { %p1011_p13 = pneg %p1010_p7 }
  0x65   : > { %p1016_p2 = pnand %p1015_p0, %p1011_p13 }
  0x67   : > { %1019 = shalt.err (!%p1016_p2)
}
  0x68   : > { %s1020_s28 = scalar_lea.vmem %s246_s0, 256  ;;  %p1421_p6 = pmov %p1420_p10 }
  0x69   : > { %p1021_p4 = scmp.ne.s32.totalorder %s246_s0, %s1020_s28  ;;  %s1119_s29 = smov [#allocation8]  }
  0x6a   : > { %s1025_s27 = sshll.u32 %s1119_s29, 4  ;;  %s1026_s27 = int_to_ptr.vmem [resolvable:$false] %s1025_s27 }
  0x6b   : > { %p1023_p8 = pnand %p1021_p4, %p1421_p6  ;;  %s1027_s2 = scalar_lea.vmem %s1026_s27, 512 }
  0x6c   : > { %p1028_p12 = scmp.lt.s32.totalorder %s246_s0, %s1026_s27  ;;  %p1029_p9 = scmp.lt.s32.totalorder %s1027_s2, %s1020_s28 }
  0x6d   : > { %p1024_p3 = pneg %p1023_p8 }
  0x6e   : > { %p1030_p10 = por %p1029_p9, %p1028_p12 }
  0x70   : > { %p1031_p7 = pnand %p1030_p10, %p1024_p3 }
  0x72   : > { %1034 = shalt.err (!%p1031_p7)
}
  0x73   : > { %843 = dma.hbm_to_vmem [thread:$0]  (!%p1254_p5), %s243_s30, 256, %s246_s0, %s1260_s15  }
  0x74   : > { %p1422_p13 = scmp.ne.s32.totalorder %s1409_s26, 0 }
  0x75   : > { %p1423_p11 = scmp.eq.s32.totalorder (!%p1422_p13), %s1172_s22, 0 }
  0x76   : > { %254 = sbr.rel (%p1422_p13) target bundleno = 600 (0x258), region = 40 }
  0x7b   : > { %1078 = dma.done.wait (%p1423_p11), [#allocation3], 32   ;;  %p1424_p1 = pmov %p1423_p11 }
  0x7d   : > { %1080 = vsyncadd (%p1424_p1), [#allocation3], 4294967264  ;;  %p1425_p0 = pmov %p1424_p1 }
  0x7f   : > { %1082 = dma.done.wait (%p1425_p0), [#allocation6], 32   ;;  %p1426_p2 = pmov %p1425_p0 }
  0x80   : > { %s264_s1 = sand.u32 1, %s1172_s22   ;;  %s1328_s16 = sand.u32 1, %s1103_s19  }
  0x81   : > { %1084 = vsyncadd (%p1426_p2), [#allocation6], 4294967264  ;;  %s733_s26 = sshll.u32 %s1328_s16, 4  ;;  %s265_s12 = scalar_lea.sflag [#allocation3], %s264_s1 }
  0x82   : > { %s1331_s15 = scalar_lea.vmem [#allocation7], %s733_s26  ;;  %p1427_p5 = scmp.ne.s32.totalorder %s1407_s24, 0 }
  0x84   : > { %1086 = dma.done.wait (%p1427_p5), %s265_s12, 512  }
  0x85   : > { %1088 = vsyncadd (%p1427_p5), %s265_s12, 4294966784  ;;  %s1337_s11 = scalar_lea.vmem [#allocation8], %s733_s26  ;;  %p1428_p4 = pmov %p1425_p0 }
  0x86   : > { %p1429_p6 = pmov %p1425_p0 }
  0x87   : > { %1090 = dma.done.wait (%p1428_p4), [#allocation6], 8192  }
  0x88   : > { %1092 = vsyncadd (%p1429_p6), [#allocation6], 4294959104  ;;  %v354_v0 = vld [vmem:[#allocation9 + $0xf8] sm:$0xff]  ;;  %v353_v1 = vld [vmem:[#allocation9 + $0xf0] sm:$0xff]  ;;  %vm561_vm0 = vcmask 254976   ;;  %vm565_vm1 = vcmask 1041408   ;;  %p1430_p8 = pmov %p1425_p0 }
  0x89   : > { %v352_v2 = vld [vmem:[#allocation9 + $0xe8] sm:$0xff]  ;;  %387 = vmatprep.subr.mxu0 %v354_v0  ;;  %745 = vmatprep.subr.mxu1 %v354_v0  ;;  %v351_v3 = vld [vmem:[#allocation9 + $0xe0] sm:$0xff]  ;;  %v350_v4 = vld [vmem:[#allocation9 + $0xd8] sm:$0xff]  ;;  %s736_s10 = sshll.u32 %s1328_s16, 3  ;;  %s740_s23 = sshll.u32 %s1172_s22, 7 }
  0x8a   : > { %388 = vmatpush1.msra.mxu0 %v353_v1  ;;  %777 = vmatpush1.msra.mxu1 %v353_v1  ;;  %v349_v5 = vld [vmem:[#allocation9 + $0xd0] sm:$0xff]  ;;  %v348_v6 = vld [vmem:[#allocation9 + $0xc8] sm:$0xff]  ;;  %v347_v7 = vld [vmem:[#allocation9 + $0xc0] sm:$0xff]  ;;  %s573_s24 = scalar_select %p1430_p8, 1, 0 }
  0x8b   : > { %389 = vmatprep.subr.mxu0 %v352_v2  ;;  %746 = vmatprep.subr.mxu1 %v352_v2  ;;  %v346_v8 = vld [vmem:[#allocation9 + $0xb8] sm:$0xff]  ;;  %v345_v9 = vld [vmem:[#allocation9 + $0xb0] sm:$0xff]  ;;  %v344_v10 = vld [vmem:[#allocation9 + $0xa8] sm:$0xff]  ;;  %s312_s13 = scalar_lea.vmem [#allocation10], %s736_s10  ;;  %s1354_s6 = scalar_lea.hbm %s1396_s5, %s740_s23 }
  0x8c   : > { %390 = vmatpush1.msra.mxu0 %v351_v3  ;;  %778 = vmatpush1.msra.mxu1 %v351_v3  ;;  %v343_v11 = vld [vmem:[#allocation9 + $0xa0] sm:$0xff]  ;;  %v342_v12 = vld [vmem:[#allocation9 + $0x98] sm:$0xff]  ;;  %v341_v13 = vld [vmem:[#allocation9 + $0x90] sm:$0xff]  ;;  %s600_s30 = sshll.u32 %s312_s13, 4  ;;  %s587_s9 = scalar_lea.sflag [#allocation4], %s1328_s16  ;;  %s601_s30 = int_to_ptr.vmem [resolvable:$true] %s600_s30 }
  0x8d   : > { %391 = vmatprep.subr.mxu0 %v350_v4  ;;  %747 = vmatprep.subr.mxu1 %v350_v4  ;;  %v340_v14 = vld [vmem:[#allocation9 + $0x88] sm:$0xff]  ;;  %v339_v15 = vld [vmem:[#allocation9 + $0x80] sm:$0xff]  ;;  %v338_v16 = vld [vmem:[#allocation9 + $0x78] sm:$0xff]  ;;  %s1035_s14 = scalar_lea.vmem %s601_s30, 128  ;;  %p1431_p12 = scmp.ne.s32.totalorder %s1415_s17, 0 }
  0x8e   : > { %392 = vmatpush1.msra.mxu0 %v349_v5  ;;  %779 = vmatpush1.msra.mxu1 %v349_v5  ;;  %v337_v17 = vld [vmem:[#allocation9 + $0x70] sm:$0xff]  ;;  %v336_v18 = vld [vmem:[#allocation9 + $0x68] sm:$0xff]  ;;  %v335_v19 = vld [vmem:[#allocation9 + $0x60] sm:$0xff]  ;;  %p1036_p3 = scmp.ne.s32.totalorder %s601_s30, %s1035_s14  ;;  %s1120_s22 = smov [#allocation10]  }
  0x8f   : > { %393 = vmatprep.subr.mxu0 %v348_v6  ;;  %748 = vmatprep.subr.mxu1 %v348_v6  ;;  %v334_v20 = vld [vmem:[#allocation9 + $0x58] sm:$0xff]  ;;  %v333_v21 = vld [vmem:[#allocation9 + $0x50] sm:$0xff]  ;;  %v332_v22 = vld [vmem:[#allocation9 + $0x48] sm:$0xff]  ;;  %s1039_s28 = sshll.u32 %s1120_s22, 4  ;;  %s1040_s28 = int_to_ptr.vmem [resolvable:$false] %s1039_s28 }
  0x90   : > { %394 = vmatpush1.msra.mxu0 %v347_v7  ;;  %780 = vmatpush1.msra.mxu1 %v347_v7  ;;  %v331_v23 = vld [vmem:[#allocation9 + $0x40] sm:$0xff]  ;;  %v330_v24 = vld [vmem:[#allocation9 + $0x38] sm:$0xff]  ;;  %v329_v25 = vld [vmem:[#allocation9 + $0x30] sm:$0xff]  ;;  %p1037_p9 = pnand %p1036_p3, %p1431_p12  ;;  %s1041_s29 = scalar_lea.vmem %s1040_s28, 256 }
  0x91   : > { %395 = vmatprep.subr.mxu0 %v346_v8  ;;  %749 = vmatprep.subr.mxu1 %v346_v8  ;;  %v328_v26 = vld [vmem:[#allocation9 + $0x28] sm:$0xff]  ;;  %v327_v27 = vld [vmem:[#allocation9 + $0x20] sm:$0xff]  ;;  %v326_v28 = vld [vmem:[#allocation9 + $0x18] sm:$0xff]  ;;  %p1042_p7 = scmp.lt.s32.totalorder %s601_s30, %s1040_s28  ;;  %p1043_p13 = scmp.lt.s32.totalorder %s1041_s29, %s1035_s14 }
  0x92   : > { %396 = vmatpush1.msra.mxu0 %v345_v9  ;;  %781 = vmatpush1.msra.mxu1 %v345_v9  ;;  %v325_v29 = vld [vmem:[#allocation9 + $0x10] sm:$0xff]  ;;  %v324_v30 = vld [vmem:[#allocation9 + $0x8] sm:$0xff]  ;;  %v323_v31 = vld [vmem:[#allocation9] sm:$0xff]  ;;  %p1038_p10 = pneg %p1037_p9 }
  0x93   : > { %397 = vmatprep.subr.mxu0 %v344_v10  ;;  %750 = vmatprep.subr.mxu1 %v344_v10  ;;  %v386_v32 = vld [vmem:[#allocation9 + $0x1f8] sm:$0xff]  ;;  %v385_v33 = vld [vmem:[#allocation9 + $0x1f0] sm:$0xff]  ;;  %v384_v34 = vld [vmem:[#allocation9 + $0x1e8] sm:$0xff]  ;;  %p1044_p11 = por %p1043_p13, %p1042_p7 }
  0x94   : > { %398 = vmatpush1.msra.mxu0 %v343_v11  ;;  %782 = vmatpush1.msra.mxu1 %v343_v11  ;;  %v383_v35 = vld [vmem:[#allocation9 + $0x1e0] sm:$0xff]  ;;  %v382_v36 = vld [vmem:[#allocation9 + $0x1d8] sm:$0xff]  ;;  %v381_v37 = vld [vmem:[#allocation9 + $0x1d0] sm:$0xff] }
  0x95   : > { %399 = vmatprep.subr.mxu0 %v342_v12  ;;  %751 = vmatprep.subr.mxu1 %v342_v12  ;;  %v380_v38 = vld [vmem:[#allocation9 + $0x1c8] sm:$0xff]  ;;  %v379_v39 = vld [vmem:[#allocation9 + $0x1c0] sm:$0xff]  ;;  %v378_v40 = vld [vmem:[#allocation9 + $0x1b8] sm:$0xff]  ;;  %p1045_p1 = pnand %p1044_p11, %p1038_p10 }
  0x96   : > { %400 = vmatpush1.msra.mxu0 %v341_v13  ;;  %783 = vmatpush1.msra.mxu1 %v341_v13  ;;  %v377_v41 = vld [vmem:[#allocation9 + $0x1b0] sm:$0xff]  ;;  %v376_v42 = vld [vmem:[#allocation9 + $0x1a8] sm:$0xff]  ;;  %v375_v43 = vld [vmem:[#allocation9 + $0x1a0] sm:$0xff] }
  0x97   : > { %401 = vmatprep.subr.mxu0 %v340_v14  ;;  %752 = vmatprep.subr.mxu1 %v340_v14  ;;  %v374_v44 = vld [vmem:[#allocation9 + $0x198] sm:$0xff]  ;;  %v373_v45 = vld [vmem:[#allocation9 + $0x190] sm:$0xff]  ;;  %v372_v46 = vld [vmem:[#allocation9 + $0x188] sm:$0xff] }
  0x98   : > { %402 = vmatpush1.msra.mxu0 %v339_v15  ;;  %784 = vmatpush1.msra.mxu1 %v339_v15  ;;  %v371_v47 = vld [vmem:[#allocation9 + $0x180] sm:$0xff]  ;;  %v370_v48 = vld [vmem:[#allocation9 + $0x178] sm:$0xff]  ;;  %v369_v49 = vld [vmem:[#allocation9 + $0x170] sm:$0xff] }
  0x99   : > { %403 = vmatprep.subr.mxu0 %v338_v16  ;;  %753 = vmatprep.subr.mxu1 %v338_v16  ;;  %v368_v50 = vld [vmem:[#allocation9 + $0x168] sm:$0xff]  ;;  %v367_v51 = vld [vmem:[#allocation9 + $0x160] sm:$0xff]  ;;  %v366_v52 = vld [vmem:[#allocation9 + $0x158] sm:$0xff] }
  0x9a   : > { %404 = vmatpush1.msra.mxu0 %v337_v17  ;;  %785 = vmatpush1.msra.mxu1 %v337_v17  ;;  %v365_v53 = vld [vmem:[#allocation9 + $0x150] sm:$0xff]  ;;  %v364_v54 = vld [vmem:[#allocation9 + $0x148] sm:$0xff]  ;;  %v363_v55 = vld [vmem:[#allocation9 + $0x140] sm:$0xff] }
  0x9b   : > { %405 = vmatprep.subr.mxu0 %v336_v18  ;;  %754 = vmatprep.subr.mxu1 %v336_v18  ;;  %v362_v56 = vld [vmem:[#allocation9 + $0x138] sm:$0xff]  ;;  %v361_v57 = vld [vmem:[#allocation9 + $0x130] sm:$0xff]  ;;  %v360_v58 = vld [vmem:[#allocation9 + $0x128] sm:$0xff] }
  0x9c   : > { %406 = vmatpush1.msra.mxu0 %v335_v19  ;;  %786 = vmatpush1.msra.mxu1 %v335_v19  ;;  %v359_v59 = vld [vmem:[#allocation9 + $0x120] sm:$0xff]  ;;  %v358_v60 = vld [vmem:[#allocation9 + $0x118] sm:$0xff]  ;;  %v357_v61 = vld [vmem:[#allocation9 + $0x110] sm:$0xff] }
  0x9d   : > { %407 = vmatprep.subr.mxu0 %v334_v20  ;;  %755 = vmatprep.subr.mxu1 %v334_v20  ;;  %v316_v62 = vld [vmem:[%s1337_s11 + $0x8] sm:$0xff]  ;;  %v315_v1 = vld [vmem:[%s1337_s11] sm:$0xff] }
  0x9e   : > { %408 = vmatpush1.msra.mxu0 %v333_v21  ;;  %787 = vmatpush1.msra.mxu1 %v333_v21  ;;  %v356_v63 = vld [vmem:[#allocation9 + $0x108] sm:$0xff]  ;;  %v355_v2 = vld [vmem:[#allocation9 + $0x100] sm:$0xff]  ;;  %v320_v4 = vmul.f32 %v316_v62, %v316_v62  ;;  %v319_v5 = vmul.f32 %v315_v1, %v315_v1  ;;  %v556_v16 = vld [vmem:[#allocation5] sm:$0x3] }
  0x9f   : > { %409 = vmatprep.subr.mxu0 %v332_v22  ;;  %756 = vmatprep.subr.mxu1 %v332_v22  ;;  %v314_v0 = vld [vmem:[%s1331_s15 + $0x8] sm:$0xff]  ;;  %v313_v3 = vld [vmem:[%s1331_s15] sm:$0xff] }
  0xa0   : > { %410 = vmatpush1.msra.mxu0 %v331_v23  ;;  %788 = vmatpush1.msra.mxu1 %v331_v23  ;;  %v322_v6 = vmul.f32 %v316_v62, %v314_v0  ;;  %v318_v7 = vmul.f32 %v314_v0, %v314_v0  ;;  %v321_v8 = vmul.f32 %v315_v1, %v313_v3  ;;  %v738_v10 = vadd.f32 -0.5, %v314_v0  ;;  %v557_v17 = vld [vmem:[#allocation2] sm:$0x3] }
  0xa1   : > { %411 = vmatprep.subr.mxu0 %v330_v24  ;;  %757 = vmatprep.subr.mxu1 %v330_v24  ;;  %v317_v9 = vmul.f32 %v313_v3, %v313_v3  ;;  %v737_v11 = vadd.f32 -0.5, %v313_v3  ;;  %v558_v18 = vsub.f32 %v556_v16, %v557_v17 }
  0xa2   : > { %412 = vmatpush1.msra.mxu0 %v329_v25  ;;  %789 = vmatpush1.msra.mxu1 %v329_v25  ;;  %v527_v12 = vmul.f32 %v738_v10, %v738_v10 }
  0xa3   : > { %413 = vmatprep.subr.mxu0 %v328_v26  ;;  %758 = vmatprep.subr.mxu1 %v328_v26  ;;  %v526_v13 = vmul.f32 %v737_v11, %v737_v11  ;;  %v560_v19 = vmul.f32 %v558_v18, %v558_v18 }
  0xa4   : > { %414 = vmatpush1.msra.mxu0 %v327_v27  ;;  %790 = vmatpush1.msra.mxu1 %v327_v27  ;;  %v529_v15 = vadd.f32 1e-05, %v527_v12 }
  0xa5   : > { %415 = vmatprep.subr.mxu0 %v326_v28  ;;  %759 = vmatprep.subr.mxu1 %v326_v28  ;;  %v528_v14 = vadd.f32 1e-05, %v526_v13  ;;  %v562_v20 = vsel %vm561_vm0, %v560_v19, 0.0 }
  0xa6   : > { %416 = vmatpush1.msra.mxu0 %v325_v29  ;;  %791 = vmatpush1.msra.mxu1 %v325_v29 }
  0xa7   : > { %417 = vmatprep.subr.mxu0 %v324_v30  ;;  %760 = vmatprep.subr.mxu1 %v324_v30  ;;  %893 = vrcp.f32 %v528_v14 }
  0xa8   : > { %418 = vmatpush1.msra.mxu0 %v323_v31  ;;  %792 = vmatpush1.msra.mxu1 %v323_v31  ;;  %895 = vrcp.f32 %v529_v15 }
  0xa9   : > { %419 = vmatprep.subr.mxu0 %v386_v32  ;;  %761 = vmatprep.subr.mxu1 %v386_v32 }
  0xaa   : > { %420 = vmatpush2.msra.mxu0 %v385_v33  ;;  %793 = vmatpush2.msra.mxu1 %v385_v33 }
  0xab   : > { %421 = vmatprep.subr.mxu0 %v384_v34  ;;  %762 = vmatprep.subr.mxu1 %v384_v34 }
  0xac   : > { %422 = vmatpush2.msra.mxu0 %v383_v35  ;;  %794 = vmatpush2.msra.mxu1 %v383_v35 }
  0xad   : > { %423 = vmatprep.subr.mxu0 %v382_v36  ;;  %763 = vmatprep.subr.mxu1 %v382_v36 }
  0xae   : > { %424 = vmatpush2.msra.mxu0 %v381_v37  ;;  %795 = vmatpush2.msra.mxu1 %v381_v37 }
  0xaf   : > { %425 = vmatprep.subr.mxu0 %v380_v38  ;;  %764 = vmatprep.subr.mxu1 %v380_v38 }
  0xb0   : > { %426 = vmatpush2.msra.mxu0 %v379_v39  ;;  %796 = vmatpush2.msra.mxu1 %v379_v39 }
  0xb1   : > { %427 = vmatprep.subr.mxu0 %v378_v40  ;;  %765 = vmatprep.subr.mxu1 %v378_v40 }
  0xb2   : > { %428 = vmatpush2.msra.mxu0 %v377_v41  ;;  %797 = vmatpush2.msra.mxu1 %v377_v41 }
  0xb3   : > { %429 = vmatprep.subr.mxu0 %v376_v42  ;;  %766 = vmatprep.subr.mxu1 %v376_v42 }
  0xb4   : > { %430 = vmatpush2.msra.mxu0 %v375_v43  ;;  %798 = vmatpush2.msra.mxu1 %v375_v43  ;;  %v894_v21 = vpop.eup %893 }
  0xb5   : > { %431 = vmatprep.subr.mxu0 %v374_v44  ;;  %767 = vmatprep.subr.mxu1 %v374_v44  ;;  %v896_v22 = vpop.eup %895  ;;  %v532_v23 = vmul.f32 %v894_v21, %v528_v14 }
  0xb6   : > { %432 = vmatpush2.msra.mxu0 %v373_v45  ;;  %799 = vmatpush2.msra.mxu1 %v373_v45  ;;  %v533_v24 = vmul.f32 %v896_v22, %v529_v15 }
  0xb7   : > { %433 = vmatprep.subr.mxu0 %v372_v46  ;;  %768 = vmatprep.subr.mxu1 %v372_v46  ;;  %v534_v25 = vsub.f32 2.0, %v532_v23 }
  0xb8   : > { %434 = vmatpush2.msra.mxu0 %v371_v47  ;;  %800 = vmatpush2.msra.mxu1 %v371_v47  ;;  %v535_v26 = vsub.f32 2.0, %v533_v24 }
  0xb9   : > { %435 = vmatprep.subr.mxu0 %v370_v48  ;;  %769 = vmatprep.subr.mxu1 %v370_v48  ;;  %v536_v27 = vmul.f32 %v894_v21, %v534_v25 }
  0xba   : > { %436 = vmatpush2.msra.mxu0 %v369_v49  ;;  %801 = vmatpush2.msra.mxu1 %v369_v49  ;;  %v537_v28 = vmul.f32 %v896_v22, %v535_v26 }
  0xbb   : > { %437 = vmatprep.subr.mxu0 %v368_v50  ;;  %770 = vmatprep.subr.mxu1 %v368_v50 }
  0xbc   : > { %438 = vmatpush2.msra.mxu0 %v367_v51  ;;  %802 = vmatpush2.msra.mxu1 %v367_v51  ;;  %v547_v29 = vadd.f32 %v537_v28, %v536_v27 }
  0xbd   : > { %439 = vmatprep.subr.mxu0 %v366_v52  ;;  %771 = vmatprep.subr.mxu1 %v366_v52 }
  0xbe   : > { %440 = vmatpush2.msra.mxu0 %v365_v53  ;;  %803 = vmatpush2.msra.mxu1 %v365_v53 }
  0xbf   : > { %441 = vmatprep.subr.mxu0 %v364_v54  ;;  %772 = vmatprep.subr.mxu1 %v364_v54 }
  0xc0   : > { %442 = vmatpush2.msra.mxu0 %v363_v55  ;;  %804 = vmatpush2.msra.mxu1 %v363_v55 }
  0xc1   : > { %443 = vmatprep.subr.mxu0 %v362_v56  ;;  %773 = vmatprep.subr.mxu1 %v362_v56 }
  0xc2   : > { %444 = vmatpush2.msra.mxu0 %v361_v57  ;;  %805 = vmatpush2.msra.mxu1 %v361_v57 }
  0xc3   : > { %445 = vmatprep.subr.mxu0 %v360_v58  ;;  %774 = vmatprep.subr.mxu1 %v360_v58 }
  0xc4   : > { %446 = vmatpush2.msra.mxu0 %v359_v59  ;;  %806 = vmatpush2.msra.mxu1 %v359_v59 }
  0xc5   : > { %447 = vmatprep.subr.mxu0 %v358_v60  ;;  %775 = vmatprep.subr.mxu1 %v358_v60 }
  0xc6   : > { %448 = vmatpush2.msra.mxu0 %v357_v61  ;;  %807 = vmatpush2.msra.mxu1 %v357_v61 }
  0xc7   : > { %449 = vmatprep.subr.mxu0 %v356_v63  ;;  %451 = vmatprep.mubr.f32.mxu0 %v314_v0 }
  0xc8   : > { %450 = vmatpush2.msra.mxu0 %v355_v2  ;;  %776 = vmatprep.subr.mxu1 %v356_v63 }
  0xc9   : > { %452 = vmatmul.mubr.f32.vlgmr.msra.gmra.mxu0 %v313_v3  ;;  %808 = vmatpush2.msra.mxu1 %v355_v2 }
  0xca   : > { %469 = vmatprep.mubr.f32.mxu1 %v320_v4  ;;  %457 = vmatprep.mubr.f32.mxu0 %v316_v62 }
  0xcb   : > { %470 = vmatmul.mubr.f32.vlgmr.msra.gmra.mxu1 %v319_v5  ;;  %563 = vadd.xlane.f32.xlu0 %v562_v20 }
  0xcc   : > { %475 = vmatprep.mubr.f32.mxu1 %v322_v6 }
  0xcd   : > { %458 = vmatmul.mubr.f32.gmra.mxu0 %v315_v1 }
  0xce   : > { %463 = vmatprep.mubr.f32.mxu0 %v318_v7 }
  0xcf   : > { %476 = vmatmul.mubr.f32.gmra.mxu1 %v321_v8  ;;  %548 = vadd.xlane.f32.xlu0 %v547_v29  ;;  %v577_v29 = vlaneseq }
  0xd1   : > { %464 = vmatmul.mubr.f32.gmra.mxu0 %v317_v9 }
 0x154   : > { %v564_v19 = vpop.xlane.xlu0 %563 }
 0x155   : > { %v566_v20 = vsel %vm565_vm1, %v564_v19, 0.0 }
 0x156   : > { %v567_v21 = vrot.slane %v566_v20, 4 }
 0x158   : > { %v549_v22 = vpop.xlane.xlu0 %548  ;;  %v568_v23 = vadd.f32 %v567_v21, %v566_v20 }
 0x159   : > { %v550_v24 = vrot.slane %v549_v22, 4 }
 0x15a   : > { %v569_v25 = vrot.slane %v568_v23, 2 }
 0x15b   : > { %v551_v26 = vadd.f32 %v550_v24, %v549_v22 }
 0x15c   : > { %v570_v27 = vadd.f32 %v569_v25, %v568_v23 }
 0x15d   : > { %v552_v28 = vrot.slane %v551_v26, 2 }
 0x189   : > { %v453_v30 = vpop.f32.mrf.mxu0 }
 0x18a   : > { %v484_v36 = vmul.f32 %v453_v30, %v453_v30 }
 0x18b   : > { %v455_v31 = vpop.f32.mrf.mxu0  ;;  %v471_v34 = vpop.f32.mrf.mxu1 }
 0x18c   : > { %v485_v39 = vmul.f32 %v455_v31, %v455_v31 }
 0x18d   : > { %v459_v32 = vpop.f32.mrf.mxu0  ;;  %v473_v43 = vpop.f32.mrf.mxu1 }
 0x18e   : > { %v486_v33 = vmul.f32 %v459_v32, %v459_v32  ;;  %v482_v57 = vmul.f32 %v459_v32, %v453_v30  ;;  %v571_v30 = vrot.slane %v570_v27, 1  ;;  %v553_v32 = vadd.f32 %v552_v28, %v551_v26 }
 0x18f   : > { %v461_v35 = vpop.f32.mrf.mxu0  ;;  %v477_v56 = vpop.f32.mrf.mxu1 }
 0x190   : > { %v487_v37 = vmul.f32 %v461_v35, %v461_v35  ;;  %v500_v40 = vadd.f32 %v486_v33, %v484_v36  ;;  %v506_v41 = vsub.f32 %v471_v34, %v486_v33  ;;  %v483_v58 = vmul.f32 %v461_v35, %v455_v31 }
 0x191   : > { %v465_v38 = vpop.f32.mrf.mxu0  ;;  %v479_v59 = vpop.f32.mrf.mxu1  ;;  %v488_v60 = vsub.f32 %v477_v56, %v482_v57  ;;  %v490_v1 = vmul.f32 2.0, %v482_v57  ;;  %v574_v31 = vstv %s573_s24  ;;  %v578_v35 = vand.u32 127, %v577_v29 }
 0x192   : > { %v504_v42 = vsub.f32 %v465_v38, %v484_v36  ;;  %v501_v45 = vadd.f32 %v487_v37, %v485_v39  ;;  %v507_v46 = vsub.f32 %v473_v43, %v487_v37  ;;  %v502_v49 = vadd.f32 0.0001, %v500_v40 }
 0x193   : > { %v467_v44 = vpop.f32.mrf.mxu0  ;;  %v489_v61 = vsub.f32 %v479_v59, %v483_v58  ;;  %v494_v62 = vmul.f32 2.0, %v488_v60  ;;  %v491_v2 = vmul.f32 2.0, %v483_v58  ;;  %v492_v9 = vadd.f32 0.0001, %v490_v1 }
 0x194   : > { %v508_v47 = vadd.f32 %v506_v41, %v504_v42  ;;  %v505_v48 = vsub.f32 %v467_v44, %v485_v39  ;;  %v503_v52 = vadd.f32 0.0001, %v501_v45  ;;  %v572_v36 = vadd.f32 %v571_v30, %v570_v27 }
 0x195   : > { %v495_v63 = vmul.f32 2.0, %v489_v61  ;;  %v496_v5 = vadd.f32 0.0009, %v494_v62  ;;  %v493_v10 = vadd.f32 0.0001, %v491_v2  ;;  %vm575_vm2 = vcmp.eq.s32.totalorder %v574_v31, 1 }
 0x196   : > { %v510_v50 = vadd.f32 0.0009, %v508_v47  ;;  %v509_v51 = vadd.f32 %v507_v46, %v505_v48  ;;  %v554_v38 = vrot.slane %v553_v32, 1  ;;  %vm581_vm3 = vcmp.eq.s32.totalorder %v578_v35, 2 }
 0x197   : > { %v497_v6 = vadd.f32 0.0009, %v495_v63  ;;  %v498_v13 = vmul.f32 %v496_v5, %v492_v9  ;;  %v576_v40 = vsel %vm575_vm2, %v572_v36, 0.0  ;;  %vm580_vm4 = vcmp.eq.s32.totalorder %v578_v35, 1 }
 0x198   : > { %v512_v53 = vmul.f32 %v510_v50, %v502_v49  ;;  %v511_v54 = vadd.f32 0.0009, %v509_v51  ;;  %v555_v42 = vadd.f32 %v554_v38, %v553_v32  ;;  %v582_v43 = vsel %vm581_vm3, %v576_v40, 0.0 }
 0x199   : > { %v499_v14 = vmul.f32 %v497_v6, %v493_v10  ;;  %vm579_vm5 = vcmp.eq.s32.totalorder %v578_v35, 0 }
 0x19a   : > { %897 = vrcp.f32 %v512_v53  ;;  %v513_v55 = vmul.f32 %v511_v54, %v503_v52  ;;  %v583_v46 = vsel %vm580_vm4, %v555_v42, %v582_v43 }
 0x19c   : > { %899 = vrcp.f32 %v513_v55 }
 0x1a7   : > { %v898_v0 = vpop.eup %897 }
 0x1a8   : > { %v516_v3 = vmul.f32 %v898_v0, %v512_v53 }
 0x1a9   : > { %v900_v4 = vpop.eup %899 }
 0x1aa   : > { %v517_v7 = vmul.f32 %v900_v4, %v513_v55  ;;  %v518_v8 = vsub.f32 2.0, %v516_v3 }
 0x1ac   : > { %v519_v11 = vsub.f32 2.0, %v517_v7  ;;  %v520_v12 = vmul.f32 %v898_v0, %v518_v8 }
 0x1ae   : > { %v521_v15 = vmul.f32 %v900_v4, %v519_v11  ;;  %v522_v16 = vmul.f32 %v520_v12, %v498_v13 }
 0x1b0   : > { %v523_v17 = vmul.f32 %v521_v15, %v499_v14 }
 0x1b2   : > { %v538_v18 = vadd.f32 %v523_v17, %v522_v16 }
 0x1b4   : > { %539 = vadd.xlane.f32.xlu1 %v538_v18 }
 0x23d   : > { %v540_v33 = vpop.xlane.xlu1 %539 }
 0x23e   : > { %v541_v34 = vrot.slane %v540_v33, 4 }
 0x240   : > { %v542_v37 = vadd.f32 %v541_v34, %v540_v33 }
 0x242   : > { %v543_v39 = vrot.slane %v542_v37, 2 }
 0x244   : > { %v544_v41 = vadd.f32 %v543_v39, %v542_v37 }
 0x246   : > { %v545_v44 = vrot.slane %v544_v41, 1 }
 0x248   : > { %v546_v45 = vadd.f32 %v545_v44, %v544_v41 }
 0x24a   : > { %v584_v47 = vsel %vm579_vm5, %v546_v45, %v583_v46 }
 0x24b   : > { %585 = vst [vmem:[%s312_s13] sm:$0xff] %v584_v47 }
 0x24c   : > { %1048 = shalt.err (!%p1045_p1)
}
 0x24d   : > { %s1049_s27 = scalar_lea.hbm %s1354_s6, 128  ;;  %s1053_s16 = scalar_lea.hbm %s1396_s5, 256 }
 0x24e   : > { %p1050_p0 = scmp.ne.s32.totalorder %s1354_s6, %s1049_s27  ;;  %p1054_p4 = scmp.lt.s32.totalorder %s1354_s6, %s1396_s5 }
 0x24f   : > { %p1055_p6 = scmp.lt.s32.totalorder %s1053_s16, %s1049_s27 }
 0x250   : > { %p1051_p2 = pnand %p1050_p0, %p1431_p12 }
 0x251   : > { %p1056_p8 = por %p1055_p6, %p1054_p4 }
 0x252   : > { %p1052_p5 = pneg %p1051_p2 }
 0x254   : > { %p1057_p3 = pnand %p1056_p8, %p1052_p5 }
 0x256   : > { %1060 = shalt.err (!%p1057_p3)
}
 0x257   : > { %825 = dma.vmem_to_hbm [thread:$0]  (%p1431_p12), %s601_s30, 128, %s1354_s6, %s587_s9  }
 0x258 PF: > { %s612_s15 = sand.u32 1, %s1099_s18   ;;  %p1432_p9 = scmp.ne.s32.totalorder %s1408_s25, 0 }
 0x259   : > { %p1433_p10 = scmp.ge.s32.totalorder %s1111_s21, 2  ;;  %s613_s11 = scalar_lea.sflag [#allocation4], %s612_s15 }
 0x25b   : > { %p845_p7 = pnand %p1433_p10, %p1432_p9 }
 0x25d   : > { %p846_p13 = pneg %p845_p7 }
 0x25f   : > { %1094 = dma.done.wait (%p846_p13), %s613_s11, 128  }
 0x260   : > { %1096 = vsyncadd (%p846_p13), %s613_s11, 4294967168  ;;  %s1434_s24 = sld [smem:[#allocation16_spill]]  ;;  %p17_p11 = scmp.ge.s32.totalorder %s1205_s7, 4  }
 0x261   : > { %s1435_s18 = smov %s1103_s19  ;;  %s1436_s19 = smov %s1107_s20 }
 0x262   : > { %s1438_s21 = smov %s1205_s7  ;;  %19 = sbr.rel (!%p17_p11) target bundleno = 9 (0x9), region = 107 }
 0x266   : > { %s1437_s20 = smov %s1434_s24 }
 0x267   :  { %618 = vsyncpa [#allocation3], 1 }
 0x268   :  { %620 = vsyncpa [#allocation3 + $0x1], 1 }
 0x269   :  { %621 = vsyncpa [#allocation6], 1 }
 0x26a   :  { %622 = vsyncpa [#allocation4], 1 }
 0x26b   :  { %624 = vsyncpa [#allocation4 + $0x1], 1 }

</bundles_post_ra>
